<compile_context>
chip_gen: v6e
topology: v6e:2x2x1
jax: 0.10.0
libtpu: 0.0.40
codegen_flags: <defaults>
</compile_context>

<pallas_src>
import jax
import jax.numpy as jnp
from jax.experimental import pallas as pl
from jax.experimental.pallas import tpu as pltpu


def mlp_kernel(xT_ref, w1_ref, b1_ref, w2_ref, b2_ref, w3_ref, b3_ref, o_ref):
    """One batch tile. xT_ref: (F, Bt); o_ref: (1, Bt) lane-dense."""
    # Layer 1: (H, F) @ (F, Bt) -> (H, Bt), f32 accumulation on the MXU.
    h1 = jnp.dot(w1_ref[...], xT_ref[...], preferred_element_type=jnp.float32)
    h1 = jnp.maximum(h1 + b1_ref[...], 0.0)
    # Layer 2: (H, H) @ (H, Bt) -> (H, Bt).
    h2 = jnp.dot(w2_ref[...], h1.astype(w2_ref.dtype),
                 preferred_element_type=jnp.float32)
    h2 = jnp.maximum(h2 + b2_ref[...], 0.0)
    # Layer 3 (out_features == 1): VPU multiply + sublane reduction instead of an
    # N=1 MXU matmul.  Result is already a lane-dense (1, Bt) row.
    out = jnp.sum(h2 * w3_ref[...], axis=0, keepdims=True) + b3_ref[0, 0]
    o_ref[...] = out.astype(o_ref.dtype)


def _pick_batch_tile(batch):
    # Lane-dense output blocks require batch_tile % 128 == 0 (or batch_tile == batch).
    # Prefer >=2 grid steps (pipelining + megacore) with a bounded per-step tile.
    if batch % 128 == 0:
        for tile in (512, 256, 128):
            if batch % tile == 0 and batch // tile >= 2:
                return tile
    return batch


def mlp_pallas(x, w1, b1, w2, b2, w3, b3, *, batch_tile=None, matmul_dtype=None):
    """x: (B, F). Weights in PyTorch nn.Linear layout:
       w1 (H, F), b1 (H,), w2 (H, H), b2 (H,), w3 (1, H), b3 (1,).  Returns (B, 1)."""
    B, F = x.shape
    H = w1.shape[0]
    out_dtype = x.dtype
    if matmul_dtype is None:
        matmul_dtype = x.dtype
    if batch_tile is None:
        batch_tile = _pick_batch_tile(B)
    assert B % batch_tile == 0
    assert batch_tile == B or batch_tile % 128 == 0

    # Transposed activations: batch on the lane axis.  MXU inputs (x, W1, W2) are cast
    # to matmul_dtype (bf16 recommended on v6e/v7x); biases/w3/accumulation stay f32.
    xT = x.T.astype(matmul_dtype)                    # (F, B)
    w1m = w1.astype(matmul_dtype)                    # (H, F)
    w2m = w2.astype(matmul_dtype)                    # (H, H)
    b1c = b1.reshape(H, 1).astype(jnp.float32)       # (H, 1)
    b2c = b2.reshape(H, 1).astype(jnp.float32)       # (H, 1)
    w3c = w3.reshape(H, 1).astype(jnp.float32)       # (H, 1) column of the 1-wide layer
    b3s = b3.reshape(1, 1).astype(jnp.float32)       # scalar, lives in SMEM

    grid = (B // batch_tile,)
    out_row = pl.pallas_call(
        mlp_kernel,
        out_shape=jax.ShapeDtypeStruct((1, B), out_dtype),
        grid_spec=pltpu.PrefetchScalarGridSpec(
            num_scalar_prefetch=0,
            grid=grid,
            in_specs=[
                pl.BlockSpec((F, batch_tile), lambda i: (0, i)),    # x^T tile (streamed)
                pl.BlockSpec((H, F), lambda i: (0, 0)),             # W1 (resident)
                pl.BlockSpec((H, 1), lambda i: (0, 0)),             # b1 column
                pl.BlockSpec((H, H), lambda i: (0, 0)),             # W2 (resident)
                pl.BlockSpec((H, 1), lambda i: (0, 0)),             # b2 column
                pl.BlockSpec((H, 1), lambda i: (0, 0)),             # w3 column
                pl.BlockSpec(memory_space=pltpu.MemorySpace.SMEM),  # b3 scalar
            ],
            out_specs=pl.BlockSpec((1, batch_tile), lambda i: (0, i)),  # lane-dense out
        ),
        compiler_params=pltpu.CompilerParams(
            dimension_semantics=("parallel",),
        ),
    )(xT, w1m, b1c, w2m, b2c, w3c, b3s)
    return out_row.reshape(B, 1)


def mlp_reference(x, w1, b1, w2, b2, w3, b3):
    h1 = jnp.maximum(jnp.dot(x, w1.T, precision="highest") + b1, 0.0)
    h2 = jnp.maximum(jnp.dot(h1, w2.T, precision="highest") + b2, 0.0)
    return jnp.dot(h2, w3.T, precision="highest") + b3


if __name__ == "__main__":
    feature_number = 32
    hidden = 2 * feature_number
    batch = 8

    key = jax.random.PRNGKey(0)
    kx, k1, kb1, k2, kb2, k3, kb3 = jax.random.split(key, 7)

    # PyTorch-Linear-style deterministic init: weight (out, in), bias (out,).
    def init_linear(kw, kb, fan_in, fan_out):
        bound = 1.0 / float(fan_in) ** 0.5
        w = jax.random.uniform(kw, (fan_out, fan_in), jnp.float32, -bound, bound)
        b = jax.random.uniform(kb, (fan_out,), jnp.float32, -bound, bound)
        return w, b

    w1, b1 = init_linear(k1, kb1, feature_number, hidden)
    w2, b2 = init_linear(k2, kb2, hidden, hidden)
    w3, b3 = init_linear(k3, kb3, hidden, 1)

    # Small-shape check (single block, f32).
    x = jax.random.normal(kx, (batch, feature_number), dtype=jnp.float32)
    out = jax.block_until_ready(mlp_pallas(x, w1, b1, w2, b2, w3, b3))
    ref = mlp_reference(x, w1, b1, w2, b2, w3, b3)
    assert out.shape == (batch, 1)
    assert jnp.allclose(out, ref, atol=1e-4, rtol=1e-4), "f32 small-batch mismatch"

    # Larger batch exercises the multi-step grid + lane-dense tiled output path.
    big_batch = 512
    xb = jax.random.normal(kx, (big_batch, feature_number), dtype=jnp.float32)
    outb = jax.block_until_ready(mlp_pallas(xb, w1, b1, w2, b2, w3, b3))
    refb = mlp_reference(xb, w1, b1, w2, b2, w3, b3)
    assert outb.shape == (big_batch, 1)
    assert jnp.allclose(outb, refb, atol=1e-4, rtol=1e-4), "f32 tiled mismatch"

    # bf16 MXU-input path (recommended on v6e/v7x); f32 accumulation, loose tolerance.
    outbf = jax.block_until_ready(
        mlp_pallas(xb, w1, b1, w2, b2, w3, b3, matmul_dtype=jnp.bfloat16))
    assert outbf.shape == (big_batch, 1)
    assert jnp.allclose(outbf, refb, atol=1e-1, rtol=1e-1), "bf16 path mismatch"

    print("KERNEL_OK")
</pallas_src>

<mosaic_0001>
module attributes {stable_mosaic.version = 11 : i64} {
  func.func @mlp_kernel(%arg0: i32, %arg1: memref<32x8xf32, #tpu.memory_space<vmem>>, %arg2: memref<64x32xf32, #tpu.memory_space<vmem>>, %arg3: memref<64x1xf32, #tpu.memory_space<vmem>>, %arg4: memref<64x64xf32, #tpu.memory_space<vmem>>, %arg5: memref<64x1xf32, #tpu.memory_space<vmem>>, %arg6: memref<64x1xf32, #tpu.memory_space<vmem>>, %arg7: memref<1x1xf32, #tpu.memory_space<smem>>, %arg8: memref<1x8xf32, #tpu.memory_space<vmem>>) attributes {dimension_semantics = [#tpu.dimension_semantics<parallel>], iteration_bounds = array<i64: 1>, scalar_prefetch = 0 : i64, scratch_operands = 0 : i64, tpu.core_type = #tpu.core_type<tc>, window_params = [{transform_indices = @transform_0, window_bounds = array<i64: 32, 8>}, {pipeline_mode = #tpu.pipeline_mode<synchronous>, transform_indices = @transform_1, window_bounds = array<i64: 64, 32>}, {pipeline_mode = #tpu.pipeline_mode<synchronous>, transform_indices = @transform_2, window_bounds = array<i64: 64, 1>}, {pipeline_mode = #tpu.pipeline_mode<synchronous>, transform_indices = @transform_3, window_bounds = array<i64: 64, 64>}, {pipeline_mode = #tpu.pipeline_mode<synchronous>, transform_indices = @transform_4, window_bounds = array<i64: 64, 1>}, {pipeline_mode = #tpu.pipeline_mode<synchronous>, transform_indices = @transform_5, window_bounds = array<i64: 64, 1>}, {transform_indices = @transform_6, window_bounds = array<i64: 1, 1>}, {transform_indices = @transform_7, window_bounds = array<i64: 1, 8>}]} {
    %c0 = arith.constant 0 : index
    %c0_0 = arith.constant 0 : index
    %0 = vector.load %arg2[%c0, %c0_0] : memref<64x32xf32, #tpu.memory_space<vmem>>, vector<64x32xf32>
    %c0_1 = arith.constant 0 : index
    %c0_2 = arith.constant 0 : index
    %1 = vector.load %arg1[%c0_1, %c0_2] : memref<32x8xf32, #tpu.memory_space<vmem>>, vector<32x8xf32>
    %cst = arith.constant dense<0.000000e+00> : vector<64x8xf32>
    %2 = tpu.matmul %0, %1, %cst {dimension_numbers = #tpu.dot_dimension_numbers<[1], [0], [0], [1], [0, 0, 1, 1], [], []>} : vector<64x32xf32>, vector<32x8xf32>, vector<64x8xf32> -> vector<64x8xf32>
    %c0_3 = arith.constant 0 : index
    %c0_4 = arith.constant 0 : index
    %3 = vector.load %arg3[%c0_3, %c0_4] : memref<64x1xf32, #tpu.memory_space<vmem>>, vector<64x1xf32>
    %4 = vector.broadcast %3 : vector<64x1xf32> to vector<64x8xf32>
    %5 = arith.addf %2, %4 : vector<64x8xf32>
    %cst_5 = arith.constant 0.000000e+00 : f32
    %6 = vector.broadcast %cst_5 : f32 to vector<64x8xf32>
    %7 = arith.maximumf %5, %6 : vector<64x8xf32>
    %c0_6 = arith.constant 0 : index
    %c0_7 = arith.constant 0 : index
    %8 = vector.load %arg4[%c0_6, %c0_7] : memref<64x64xf32, #tpu.memory_space<vmem>>, vector<64x64xf32>
    %cst_8 = arith.constant dense<0.000000e+00> : vector<64x8xf32>
    %9 = tpu.matmul %8, %7, %cst_8 {dimension_numbers = #tpu.dot_dimension_numbers<[1], [0], [0], [1], [0, 0, 1, 1], [], []>} : vector<64x64xf32>, vector<64x8xf32>, vector<64x8xf32> -> vector<64x8xf32>
    %c0_9 = arith.constant 0 : index
    %c0_10 = arith.constant 0 : index
    %10 = vector.load %arg5[%c0_9, %c0_10] : memref<64x1xf32, #tpu.memory_space<vmem>>, vector<64x1xf32>
    %11 = vector.broadcast %10 : vector<64x1xf32> to vector<64x8xf32>
    %12 = arith.addf %9, %11 : vector<64x8xf32>
    %cst_11 = arith.constant 0.000000e+00 : f32
    %13 = vector.broadcast %cst_11 : f32 to vector<64x8xf32>
    %14 = arith.maximumf %12, %13 : vector<64x8xf32>
    %c0_12 = arith.constant 0 : index
    %c0_13 = arith.constant 0 : index
    %15 = vector.load %arg6[%c0_12, %c0_13] : memref<64x1xf32, #tpu.memory_space<vmem>>, vector<64x1xf32>
    %16 = vector.broadcast %15 : vector<64x1xf32> to vector<64x8xf32>
    %17 = arith.mulf %14, %16 : vector<64x8xf32>
    %cst_14 = arith.constant dense<0.000000e+00> : vector<8xf32>
    %18 = vector.multi_reduction <add>, %17, %cst_14 [0] : vector<64x8xf32> to vector<8xf32>
    %19 = vector.shape_cast %18 : vector<8xf32> to vector<1x8xf32>
    %c0_15 = arith.constant 0 : index
    %c0_16 = arith.constant 0 : index
    %20 = memref.load %arg7[%c0_15, %c0_16] : memref<1x1xf32, #tpu.memory_space<smem>>
    %21 = vector.broadcast %20 : f32 to vector<1x8xf32>
    %22 = arith.addf %19, %21 : vector<1x8xf32>
    %c0_17 = arith.constant 0 : index
    %c0_18 = arith.constant 0 : index
    %23 = vector.load %arg8[%c0_17, %c0_18] : memref<1x8xf32, #tpu.memory_space<vmem>>, vector<1x8xf32>
    tpu.vector_store %arg8[%c0_17, %c0_18], %22 {strides = array<i32>} : memref<1x8xf32, #tpu.memory_space<vmem>>, vector<1x8xf32>,
    return
  }
  func.func @transform_0(%arg0: i32) -> (i32, i32) {
    %c0_i32 = arith.constant 0 : i32
    %c0_i32_0 = arith.constant 0 : i32
    return %c0_i32, %arg0 : i32, i32
  }
  func.func @transform_1(%arg0: i32) -> (i32, i32) {
    %c0_i32 = arith.constant 0 : i32
    %c0_i32_0 = arith.constant 0 : i32
    %c0_i32_1 = arith.constant 0 : i32
    return %c0_i32, %c0_i32_0 : i32, i32
  }
  func.func @transform_2(%arg0: i32) -> (i32, i32) {
    %c0_i32 = arith.constant 0 : i32
    %c0_i32_0 = arith.constant 0 : i32
    %c0_i32_1 = arith.constant 0 : i32
    return %c0_i32, %c0_i32_0 : i32, i32
  }
  func.func @transform_3(%arg0: i32) -> (i32, i32) {
    %c0_i32 = arith.constant 0 : i32
    %c0_i32_0 = arith.constant 0 : i32
    %c0_i32_1 = arith.constant 0 : i32
    return %c0_i32, %c0_i32_0 : i32, i32
  }
  func.func @transform_4(%arg0: i32) -> (i32, i32) {
    %c0_i32 = arith.constant 0 : i32
    %c0_i32_0 = arith.constant 0 : i32
    %c0_i32_1 = arith.constant 0 : i32
    return %c0_i32, %c0_i32_0 : i32, i32
  }
  func.func @transform_5(%arg0: i32) -> (i32, i32) {
    %c0_i32 = arith.constant 0 : i32
    %c0_i32_0 = arith.constant 0 : i32
    %c0_i32_1 = arith.constant 0 : i32
    return %c0_i32, %c0_i32_0 : i32, i32
  }
  func.func @transform_6(%arg0: i32) -> (i32, i32) {
    %c0_i32 = arith.constant 0 : i32
    %c0_i32_0 = arith.constant 0 : i32
    %c0_i32_1 = arith.constant 0 : i32
    return %c0_i32, %c0_i32_0 : i32, i32
  }
  func.func @transform_7(%arg0: i32) -> (i32, i32) {
    %c0_i32 = arith.constant 0 : i32
    %c0_i32_0 = arith.constant 0 : i32
    return %c0_i32, %arg0 : i32, i32
  }
}

</mosaic_0001>

<bundles_post_ra>
// kernel: tpu_custom_call.1
= control target key start
LH: loop header
LB: loop body
LE: loop exit
PB: predicated region body
PF: predicated region fallthrough
CT: control target
= control target key end

     0   :  { %vm88_vm0 = vcmask 261120   ;;  %v651_v3 = vmov 0   ;;  %s855_s0 = inlined_call_operand.vmem [shape: f32[32,8], index: 0, kind: input, shape index: {}]   ;;  %s856_s1 = inlined_call_operand.vmem [shape: f32[64,32], index: 1, kind: input, shape index: {}]   ;;  %s857_s2 = inlined_call_operand.vmem [shape: f32[64,1], index: 2, kind: input, shape index: {}]   ;;  %s858_s3 = inlined_call_operand.vmem [shape: f32[64,64], index: 3, kind: input, shape index: {}]   ;;  %s859_s4 = inlined_call_operand.vmem [shape: f32[64,1], index: 4, kind: input, shape index: {}]   ;;  %s860_s5 = inlined_call_operand.vmem [shape: f32[64,1], index: 5, kind: input, shape index: {}]   ;;  %s861_s6 = inlined_call_operand.<no memory space> [shape: f32[1,1], index: 6, kind: input, shape index: {}]   ;;  %s862_s7 = inlined_call_operand.hbm [shape: f32[1,8], index: 7, kind: output, shape index: {}]  }
   0x1   :  { %v39_v0 = vld [vmem:[%s855_s0 + $0x18] sm:$0xff]  ;;  %v38_v1 = vld [vmem:[%s855_s0 + $0x10] sm:$0xff]  ;;  %v28_v2 = vld [vmem:[%s856_s1] sm:$0xff]  ;;  %627 = vset.pattern.permute.xlu0 %v651_v3  ;;  %628 = vset.pattern.permute.xlu1 %v651_v3 }
   0x2   :  { %561 = vmatprep.subr.mxu0 %v39_v0  ;;  %v37_v4 = vld [vmem:[%s855_s0 + $0x8] sm:$0xff]  ;;  %569 = vmatprep.mubr.msk.f32.mxu0 %vm88_vm0, %v28_v2  ;;  %v36_v5 = vld [vmem:[%s855_s0] sm:$0xff]  ;;  %v47_v6 = vld [vmem:[%s857_s2 + $0x38] sm:$0xff] }
   0x3   :  { %562 = vmatpush3.msra.mxu0 %v39_v0  ;;  %v45_v7 = vld [vmem:[%s857_s2 + $0x28] sm:$0xff]  ;;  %85 = vperm.xlu0 %627, %v47_v6   ;;  %v46_v9 = vld [vmem:[%s857_s2 + $0x30] sm:$0xff]  ;;  %v44_v11 = vld [vmem:[%s857_s2 + $0x20] sm:$0xff] }
   0x4   :  { %563 = vmatprep.subr.mxu0 %v38_v1  ;;  %v29_v8 = vld [vmem:[%s856_s1 + $0x8] sm:$0xff]  ;;  %75 = vperm.xlu1 %628, %v45_v7   ;;  %v30_v10 = vld [vmem:[%s856_s1 + $0x10] sm:$0xff]  ;;  %v31_v12 = vld [vmem:[%s856_s1 + $0x18] sm:$0xff] }
   0x5   :  { %564 = vmatpush3.msra.mxu0 %v38_v1  ;;  %v43_v13 = vld [vmem:[%s857_s2 + $0x18] sm:$0xff]  ;;  %v32_v14 = vld [vmem:[%s856_s1 + $0x20] sm:$0xff]  ;;  %v42_v15 = vld [vmem:[%s857_s2 + $0x10] sm:$0xff] }
   0x6   :  { %565 = vmatprep.subr.mxu0 %v37_v4 }
   0x7   :  { %566 = vmatpush3.msra.mxu0 %v37_v4  ;;  %80 = vperm.xlu0 %627, %v46_v9  }
   0x8   :  { %567 = vmatprep.subr.mxu0 %v36_v5  ;;  %70 = vperm.xlu1 %628, %v44_v11  }
   0x9   :  { %568 = vmatpush3.msra.mxu0 %v36_v5 }
   0xa   :  { %570 = vmatmul.mubr.msk.f32.vlgmr.msra.gmra.mxu0 %vm88_vm0, %v29_v8 }
   0xb   :  { %572 = vmatprep.mubr.msk.f32.mxu0 %vm88_vm0, %v30_v10 }
   0xc   :  { %13 = vsyncpa [#allocation4], 0  ;;  %65 = vperm.xlu0 %627, %v43_v13   ;;  %v33_v16 = vld [vmem:[%s856_s1 + $0x28] sm:$0xff]  ;;  %60 = vperm.xlu1 %628, %v42_v15   ;;  %v34_v18 = vld [vmem:[%s856_s1 + $0x30] sm:$0xff]  ;;  %vm282_vm1 = vcmask 523264   ;;  %vm476_vm2 = vcmask 64512  }
   0xd   :  { %v41_v17 = vld [vmem:[%s857_s2 + $0x8] sm:$0xff]  ;;  %v40_v19 = vld [vmem:[%s857_s2] sm:$0xff]  ;;  %v35_v20 = vld [vmem:[%s856_s1 + $0x38] sm:$0xff]  ;;  %s652_s12 = smov [#allocation3]   ;;  %vm501_vm3 = vcmask 57344  }
   0xe   :  { %573 = vmatmul.mubr.msk.f32.gmra.mxu0 %vm88_vm0, %v31_v12  ;;  %v234_v21 = vld [vmem:[%s859_s4] sm:$0xff]  ;;  %v235_v22 = vld [vmem:[%s859_s4 + $0x8] sm:$0xff]  ;;  %v236_v23 = vld [vmem:[%s859_s4 + $0x10] sm:$0xff]  ;;  %s509_s13 = sshll.u32 %s652_s12, 4  ;;  %s510_s13 = int_to_ptr.vmem [resolvable:$true] %s509_s13 }
   0xf   :  { %575 = vmatprep.mubr.msk.f32.mxu0 %vm88_vm0, %v32_v14  ;;  %v237_v24 = vld [vmem:[%s859_s4 + $0x18] sm:$0xff]  ;;  %v420_v25 = vld [vmem:[%s860_s5] sm:$0xff]  ;;  %v421_v26 = vld [vmem:[%s860_s5 + $0x8] sm:$0xff]  ;;  %s629_s14 = scalar_lea.vmem %s510_s13, 16  ;;  %s633_s15 = scalar_lea.vmem %s510_s13, 32 }
  0x10   :  { %55 = vperm.xlu0 %627, %v41_v17   ;;  %50 = vperm.xlu1 %628, %v40_v19   ;;  %v238_v27 = vld [vmem:[%s859_s4 + $0x20] sm:$0xff]  ;;  %v422_v28 = vld [vmem:[%s860_s5 + $0x10] sm:$0xff]  ;;  %v239_v29 = vld [vmem:[%s859_s4 + $0x28] sm:$0xff]  ;;  %p630_p0 = scmp.ne.s32.totalorder %s510_s13, %s629_s14  ;;  %p634_p1 = scmp.lt.s32.totalorder %s510_s13, %s510_s13 }
  0x11   :  { %v423_v30 = vld [vmem:[%s860_s5 + $0x18] sm:$0xff]  ;;  %v240_v31 = vld [vmem:[%s859_s4 + $0x30] sm:$0xff]  ;;  %v424_v32 = vld [vmem:[%s860_s5 + $0x20] sm:$0xff]  ;;  %p635_p2 = scmp.lt.s32.totalorder %s633_s15, %s629_s14 }
  0x12   :  { %576 = vmatmul.mubr.msk.f32.gmra.mxu0 %vm88_vm0, %v33_v16  ;;  %v241_v33 = vld [vmem:[%s859_s4 + $0x38] sm:$0xff]  ;;  %v425_v34 = vld [vmem:[%s860_s5 + $0x28] sm:$0xff]  ;;  %v426_v35 = vld [vmem:[%s860_s5 + $0x30] sm:$0xff] }
  0x13   :  { %578 = vmatprep.mubr.msk.f32.mxu0 %vm88_vm0, %v34_v18  ;;  %v427_v36 = vld [vmem:[%s860_s5 + $0x38] sm:$0xff]  ;;  %v226_v37 = vld [vmem:[%s858_s3] sm:$0xff]  ;;  %v228_v38 = vld [vmem:[%s858_s3 + $0x10] sm:$0xff]  ;;  %p636_p3 = por %p635_p2, %p634_p1 }
  0x14   :  { %244 = vperm.xlu0 %627, %v234_v21   ;;  %249 = vperm.xlu1 %628, %v235_v22   ;;  %v227_v7 = vld [vmem:[%s858_s3 + $0x8] sm:$0xff]  ;;  %v229_v8 = vld [vmem:[%s858_s3 + $0x18] sm:$0xff]  ;;  %v230_v9 = vld [vmem:[%s858_s3 + $0x20] sm:$0xff] }
  0x15   :  { %600 = vmatprep.mubr.msk.f32.mxu1 %vm282_vm1, %v228_v38  ;;  %v231_v10 = vld [vmem:[%s858_s3 + $0x28] sm:$0xff]  ;;  %v232_v11 = vld [vmem:[%s858_s3 + $0x30] sm:$0xff]  ;;  %v233_v12 = vld [vmem:[%s858_s3 + $0x38] sm:$0xff]  ;;  %p637_p4 = pnand %p636_p3, %p630_p0 }
  0x16   :  { %579 = vmatmul.mubr.msk.f32.gmra.mxu0 %vm88_vm0, %v35_v20 }
  0x17   :  { %597 = vmatprep.mubr.msk.f32.mxu0 %vm282_vm1, %v226_v37 }
  0x18   :  { %254 = vperm.xlu0 %627, %v236_v23   ;;  %259 = vperm.xlu1 %628, %v237_v24  }
  0x1c   :  { %430 = vperm.xlu0 %627, %v420_v25   ;;  %435 = vperm.xlu1 %628, %v421_v26  }
  0x20   :  { %264 = vperm.xlu0 %627, %v238_v27   ;;  %440 = vperm.xlu1 %628, %v422_v28  }
  0x24   :  { %269 = vperm.xlu0 %627, %v239_v29   ;;  %445 = vperm.xlu1 %628, %v423_v30  }
  0x28   :  { %274 = vperm.xlu0 %627, %v240_v31   ;;  %450 = vperm.xlu1 %628, %v424_v32  }
  0x2c   :  { %279 = vperm.xlu0 %627, %v241_v33   ;;  %455 = vperm.xlu1 %628, %v425_v34  }
  0x30   :  { %460 = vperm.xlu0 %627, %v426_v35   ;;  %465 = vperm.xlu1 %628, %v427_v36  }
  0x7e   :  { %v86_v41 = vpop.permute.xlu0 %85 }
  0x7f   :  { %v76_v43 = vpop.permute.xlu1 %75 }
  0x82   :  { %v81_v46 = vpop.permute.xlu0 %80 }
  0x83   :  { %v71_v48 = vpop.permute.xlu1 %70 }
  0x87   :  { %v66_v55 = vpop.permute.xlu0 %65  ;;  %v61_v58 = vpop.permute.xlu1 %60 }
  0x8b   :  { %v56_v63 = vpop.permute.xlu0 %55  ;;  %v51_v2 = vpop.permute.xlu1 %50 }
  0x8f   :  { %v245_v13 = vpop.permute.xlu0 %244  ;;  %v250_v14 = vpop.permute.xlu1 %249 }
  0x93   :  { %v255_v15 = vpop.permute.xlu0 %254  ;;  %v260_v16 = vpop.permute.xlu1 %259 }
  0x97   :  { %v431_v17 = vpop.permute.xlu0 %430  ;;  %v436_v18 = vpop.permute.xlu1 %435 }
  0x9b   :  { %v265_v19 = vpop.permute.xlu0 %264  ;;  %v441_v20 = vpop.permute.xlu1 %440 }
  0x9f   :  { %v270_v21 = vpop.permute.xlu0 %269  ;;  %v446_v22 = vpop.permute.xlu1 %445 }
  0xa3   :  { %v275_v25 = vpop.permute.xlu0 %274  ;;  %v451_v33 = vpop.permute.xlu1 %450 }
  0xca   :  { %v571_v39 = vpop.f32.mrf.mxu0 }
  0xcb   :  { %v185_v0 = vadd.f32 %v571_v39, %v56_v63 }
  0xcc   :  { %v179_v40 = vpop.f32.mrf.mxu0 }
  0xcd   :  { %v180_v3 = vadd.f32 %v179_v40, %v51_v2  ;;  %v219_v5 = vmax.f32 %v185_v0, 0.0 }
  0xce   :  { %v574_v42 = vpop.f32.mrf.mxu0 }
  0xcf   :  { %v195_v59 = vadd.f32 %v574_v42, %v66_v55  ;;  %v218_v6 = vmax.f32 %v180_v3, 0.0 }
  0xd0   :  { %v189_v44 = vpop.f32.mrf.mxu0 }
  0xd1   :  { %v190_v61 = vadd.f32 %v189_v44, %v61_v58  ;;  %v221_v1 = vmax.f32 %v195_v59, 0.0 }
  0xd2   :  { %v577_v45 = vpop.f32.mrf.mxu0 }
  0xd3   :  { %v205_v52 = vadd.f32 %v577_v45, %v76_v43  ;;  %v220_v4 = vmax.f32 %v190_v61, 0.0  ;;  %v280_v43 = vpop.permute.xlu0 %279 }
  0xd4   :  { %v199_v47 = vpop.f32.mrf.mxu0 }
  0xd5   :  { %v200_v56 = vadd.f32 %v199_v47, %v71_v48  ;;  %v223_v60 = vmax.f32 %v205_v52, 0.0 }
  0xd6   :  { %v580_v49 = vpop.f32.mrf.mxu0 }
  0xd7   :  { %v215_v50 = vadd.f32 %v580_v49, %v86_v41  ;;  %v222_v62 = vmax.f32 %v200_v56, 0.0  ;;  %v461_v63 = vpop.permute.xlu0 %460 }
  0xd8   :  { %v209_v51 = vpop.f32.mrf.mxu0 }
  0xd9   :  { %v225_v53 = vmax.f32 %v215_v50, 0.0  ;;  %v210_v54 = vadd.f32 %v209_v51, %v81_v46  ;;  %v456_v51 = vpop.permute.xlu1 %455 }
  0xdb   :  { %v224_v57 = vmax.f32 %v210_v54, 0.0  ;;  %581 = vmatprep.subr.mxu0 %v225_v53  ;;  %609 = vmatprep.subr.mxu1 %v225_v53 }
  0xdc   :  { %582 = vmatpush3.msra.mxu0 %v225_v53  ;;  %617 = vmatpush3.msra.mxu1 %v225_v53 }
  0xdd   :  { %583 = vmatprep.subr.mxu0 %v224_v57  ;;  %610 = vmatprep.subr.mxu1 %v224_v57  ;;  %v466_v3 = vpop.permute.xlu1 %465 }
  0xde   :  { %584 = vmatpush3.msra.mxu0 %v224_v57  ;;  %618 = vmatpush3.msra.mxu1 %v224_v57 }
  0xdf   :  { %585 = vmatprep.subr.mxu0 %v223_v60  ;;  %611 = vmatprep.subr.mxu1 %v223_v60 }
  0xe0   :  { %586 = vmatpush3.msra.mxu0 %v223_v60  ;;  %619 = vmatpush3.msra.mxu1 %v223_v60 }
  0xe1   :  { %587 = vmatprep.subr.mxu0 %v222_v62  ;;  %612 = vmatprep.subr.mxu1 %v222_v62 }
  0xe2   :  { %588 = vmatpush3.msra.mxu0 %v222_v62  ;;  %620 = vmatpush3.msra.mxu1 %v222_v62 }
  0xe3   :  { %589 = vmatprep.subr.mxu0 %v221_v1  ;;  %613 = vmatprep.subr.mxu1 %v221_v1 }
  0xe4   :  { %590 = vmatpush3.msra.mxu0 %v221_v1  ;;  %621 = vmatpush3.msra.mxu1 %v221_v1 }
  0xe5   :  { %591 = vmatprep.subr.mxu0 %v220_v4  ;;  %614 = vmatprep.subr.mxu1 %v220_v4 }
  0xe6   :  { %592 = vmatpush3.msra.mxu0 %v220_v4  ;;  %622 = vmatpush3.msra.mxu1 %v220_v4 }
  0xe7   :  { %593 = vmatprep.subr.mxu0 %v219_v5  ;;  %615 = vmatprep.subr.mxu1 %v219_v5 }
  0xe8   :  { %594 = vmatpush3.msra.mxu0 %v219_v5  ;;  %623 = vmatpush3.msra.mxu1 %v219_v5 }
  0xe9   :  { %595 = vmatprep.subr.mxu0 %v218_v6  ;;  %616 = vmatprep.subr.mxu1 %v218_v6 }
  0xea   :  { %596 = vmatpush3.msra.mxu0 %v218_v6  ;;  %624 = vmatpush3.msra.mxu1 %v218_v6 }
  0xeb   :  { %598 = vmatmul.mubr.msk.f32.vlgmr.msra.gmra.mxu0 %vm282_vm1, %v227_v7  ;;  %601 = vmatmul.mubr.msk.f32.vlgmr.msra.gmra.mxu1 %vm282_vm1, %v229_v8 }
  0xec   :  { %603 = vmatprep.mubr.msk.f32.mxu1 %vm282_vm1, %v230_v9 }
  0xef   :  { %604 = vmatmul.mubr.msk.f32.gmra.mxu1 %vm282_vm1, %v231_v10 }
  0xf0   :  { %606 = vmatprep.mubr.msk.f32.mxu1 %vm282_vm1, %v232_v11 }
  0xf3   :  { %607 = vmatmul.mubr.msk.f32.gmra.mxu1 %vm282_vm1, %v233_v12 }
 0x1ab   :  { %v599_v23 = vpop.f32.mrf.mxu0  ;;  %v602_v24 = vpop.f32.mrf.mxu1 }
 0x1ac   :  { %v379_v26 = vadd.f32 %v599_v23, %v250_v14  ;;  %v389_v27 = vadd.f32 %v602_v24, %v260_v16 }
 0x1ad   :  { %v373_v28 = vpop.f32.mrf.mxu0  ;;  %v383_v29 = vpop.f32.mrf.mxu1 }
 0x1ae   :  { %v413_v30 = vmax.f32 %v379_v26, 0.0  ;;  %v374_v31 = vadd.f32 %v373_v28, %v245_v13  ;;  %v384_v32 = vadd.f32 %v383_v29, %v255_v15  ;;  %v415_v34 = vmax.f32 %v389_v27, 0.0 }
 0x1af   :  { %v605_v35 = vpop.f32.mrf.mxu1 }
 0x1b0   :  { %v469_v36 = vmul.f32 %v436_v18, %v413_v30  ;;  %v412_v37 = vmax.f32 %v374_v31, 0.0  ;;  %v414_v38 = vmax.f32 %v384_v32, 0.0  ;;  %v399_v39 = vadd.f32 %v605_v35, %v270_v21 }
 0x1b1   :  { %v393_v40 = vpop.f32.mrf.mxu1  ;;  %v471_v44 = vmul.f32 %v446_v22, %v415_v34 }
 0x1b2   :  { %v468_v41 = vmul.f32 %v431_v17, %v412_v37  ;;  %v470_v42 = vmul.f32 %v441_v20, %v414_v38  ;;  %v394_v45 = vadd.f32 %v393_v40, %v265_v19  ;;  %v478_v47 = vsel %vm476_vm2, %v469_v36, 0.0 }
 0x1b3   :  { %v608_v46 = vpop.f32.mrf.mxu1  ;;  %v417_v49 = vmax.f32 %v399_v39, 0.0  ;;  %v482_v59 = vsel %vm476_vm2, %v471_v44, 0.0  ;;  %v499_v17 = vstv %s861_s6 }
 0x1b4   :  { %v477_v48 = vsel %vm476_vm2, %v468_v41, 0.0  ;;  %v409_v50 = vadd.f32 %v608_v46, %v280_v43  ;;  %v416_v53 = vmax.f32 %v394_v45, 0.0  ;;  %v480_v55 = vsel %vm476_vm2, %v470_v42, 0.0 }
 0x1b5   :  { %v479_v52 = vadd.f32 %v478_v47, %v477_v48  ;;  %v403_v54 = vpop.f32.mrf.mxu1  ;;  %v473_v60 = vmul.f32 %v456_v51, %v417_v49 }
 0x1b6   :  { %v404_v56 = vadd.f32 %v403_v54, %v275_v25  ;;  %v472_v58 = vmul.f32 %v451_v33, %v416_v53  ;;  %v419_v61 = vmax.f32 %v409_v50, 0.0 }
 0x1b7   :  { %v481_v57 = vadd.f32 %v480_v55, %v479_v52  ;;  %v486_v5 = vsel %vm476_vm2, %v473_v60, 0.0 }
 0x1b8   :  { %v418_v62 = vmax.f32 %v404_v56, 0.0  ;;  %v484_v1 = vsel %vm476_vm2, %v472_v58, 0.0  ;;  %v475_v6 = vmul.f32 %v466_v3, %v419_v61 }
 0x1b9   :  { %v483_v0 = vadd.f32 %v482_v59, %v481_v57 }
 0x1ba   :  { %v474_v2 = vmul.f32 %v461_v63, %v418_v62  ;;  %v490_v10 = vsel %vm476_vm2, %v475_v6, 0.0 }
 0x1bb   :  { %v485_v4 = vadd.f32 %v484_v1, %v483_v0 }
 0x1bc   :  { %v488_v8 = vsel %vm476_vm2, %v474_v2, 0.0 }
 0x1bd   :  { %v487_v7 = vadd.f32 %v486_v5, %v485_v4 }
 0x1bf   :  { %v489_v9 = vadd.f32 %v488_v8, %v487_v7 }
 0x1c1   :  { %v491_v11 = vadd.f32 %v490_v10, %v489_v9 }
 0x1c3   :  { %v492_v12 = vrot.slane %v491_v11, 4 }
 0x1c5   :  { %v493_v13 = vadd.f32 %v492_v12, %v491_v11 }
 0x1c7   :  { %v494_v14 = vrot.slane %v493_v13, 2 }
 0x1c9   :  { %v495_v15 = vadd.f32 %v494_v14, %v493_v13 }
 0x1cb   :  { %v496_v16 = vrot.slane %v495_v15, 1 }
 0x1cd   :  { %v497_v18 = vadd.f32 %v496_v16, %v495_v15 }
 0x1cf   :  { %v500_v19 = vadd.f32 %v499_v17, %v497_v18 }
 0x1d1   :  { %502 = vst.msk [vmem:[#allocation3] sm:$0x1] %vm501_vm3, %v500_v19 }
 0x1d2   :  { %640 = shalt.err (!%p637_p4)
}
 0x1d3   :  { %512 = dma.vmem_to_hbm [thread:$0]  %s510_s13, 16, %s862_s7, [#allocation4]  }
 0x1d4   :  { %649 = dma.done.wait [#allocation4], 16  }
 0x1d5   :  { %650 = vsyncadd [#allocation4], 4294967280 }
 0x1d6   :  { %516 = vsyncpa [#allocation4], 1 }

</bundles_post_ra>
